<compile_context>
chip_gen: v7x
topology: tpu7x:2x2x1
jax: 0.10.0
libtpu: 0.0.40
codegen_flags: <defaults>
</compile_context>

<pallas_src>
import functools

import jax
import jax.numpy as jnp
from jax.experimental import pallas as pl
from jax.experimental.pallas import tpu as pltpu


# ---------------------------------------------------------------------------
# Kernel: fused shared Linear+Tanh, then fused (pi|vf) head Linear+Tanh.
# Refs: x [tb, F], w_sh [F, H], b_sh [1, H], w_head [H, P+V], b_head [1, P+V],
#       out [tb, P+V] (lane-dense: P+V is a multiple of 128 here).
# ---------------------------------------------------------------------------
def mlp_extractor_kernel(x_ref, wsh_ref, bsh_ref, whd_ref, bhd_ref, out_ref):
    # shared_net: Linear + Tanh. MXU matmul with bf16 (default) or f32 inputs,
    # f32 accumulate; bias add + tanh stay f32 (v5e VPU/EUP have no bf16 path,
    # and keeping them f32 costs nothing on v6e/v7x).
    x = x_ref[...].astype(wsh_ref.dtype)
    h = jnp.tanh(
        jnp.dot(x, wsh_ref[...], preferred_element_type=jnp.float32) + bsh_ref[...]
    )
    # policy_net + value_net fused: one matmul against [H, P+V], one lane-dense
    # (unmasked vst) store of the [tb, P+V] tile.
    h = h.astype(whd_ref.dtype)
    out = jnp.tanh(
        jnp.dot(h, whd_ref[...], preferred_element_type=jnp.float32) + bhd_ref[...]
    )
    out_ref[...] = out.astype(out_ref.dtype)


# ---------------------------------------------------------------------------
# One-time param preparation (NOT in the per-step hot path).
# PyTorch convention in:  W [out, in], b [out].
# Kernel layout out:      W [in, out] (compute dtype), b [1, out] (f32),
#                         pi/vf heads concatenated along the output axis.
# Default compute dtype is bf16: the MXU is bf16-native on v5e/v6e/v7x; f32
# matmul is emulated and costs extra MXU pushes. Use compute_dtype=jnp.float32
# only when bit-level parity with the f32 reference is required.
# ---------------------------------------------------------------------------
def prepare_params(params, compute_dtype=jnp.bfloat16):
    w_sh = jnp.asarray(params["w_sh"]).T.astype(compute_dtype)             # [F, H]
    b_sh = jnp.asarray(params["b_sh"]).reshape(1, -1).astype(jnp.float32)  # [1, H]
    w_head = jnp.concatenate(
        [jnp.asarray(params["w_pi"]).T, jnp.asarray(params["w_vf"]).T], axis=1
    ).astype(compute_dtype)                                                # [H, P+V]
    b_head = jnp.concatenate(
        [jnp.asarray(params["b_pi"]), jnp.asarray(params["b_vf"])], axis=0
    ).reshape(1, -1).astype(jnp.float32)                                   # [1, P+V]
    pi_dim = params["w_pi"].shape[0]
    vf_dim = params["w_vf"].shape[0]
    return dict(w_sh=w_sh, b_sh=b_sh, w_head=w_head, b_head=b_head,
                pi_dim=pi_dim, vf_dim=vf_dim)


def _round_up_8(n):
    return ((n + 7) // 8) * 8


# ---------------------------------------------------------------------------
# Fused forward: features [B, F] -> fused latents [B, P+V] (pi columns first).
# No input padding / output slicing round-trips: the grid covers cdiv(B, tb)
# and Pallas masks the ragged last block's out-of-bounds writes.
# ---------------------------------------------------------------------------
def mlp_extractor_fused(features, prepared, *, block_batch=8192,
                        out_dtype=jnp.float32):
    B, F = features.shape
    H = prepared["w_sh"].shape[1]
    P = prepared["pi_dim"]
    V = prepared["vf_dim"]
    PV = P + V

    # Batch tile: multiple of 8 sublanes, capped at block_batch. Cap further so
    # the grid has >= 2 steps whenever the batch is splittable -> v7x megacore
    # ("parallel") can shard across both TensorCores.
    tb = min(block_batch, _round_up_8(B))
    if B > 8:
        tb = min(tb, _round_up_8(pl.cdiv(B, 2)))
    tb = max(8, _round_up_8(tb))
    grid = (pl.cdiv(B, tb),)

    x_isz = jnp.dtype(features.dtype).itemsize
    w_isz = jnp.dtype(prepared["w_sh"].dtype).itemsize
    o_isz = jnp.dtype(out_dtype).itemsize

    cost = pl.CostEstimate(
        flops=2 * B * (F * H + H * PV),
        transcendentals=B * (H + PV),
        bytes_accessed=B * (F * x_isz + PV * o_isz)
        + w_isz * (F * H + H * PV) + 4 * (H + PV),
    )

    # VMEM budget: the x block lane-pads to 128 lanes in VMEM (F=32 uses 32 of
    # 128 lanes, i.e. 4x raw size); double-buffered x + out, plus f32
    # intermediates (h, pre-activation, f32 result) and the small resident
    # weights. Clamp to stay well inside v7x's 64 MiB physical VMEM while
    # raising v5e's 16 MiB default scoped limit.
    vmem_est = (2 * tb * 128 * x_isz          # x double-buffered, lane-padded
                + 2 * tb * max(PV, 128) * o_isz   # out double-buffered
                + 4 * tb * max(PV, 128) * 4       # live f32 intermediates
                + 2 * 1024 * 1024)                # weights + headroom
    vmem_limit = int(min(max(vmem_est, 32 * 1024 * 1024), 56 * 1024 * 1024))

    fused = pl.pallas_call(
        mlp_extractor_kernel,
        out_shape=jax.ShapeDtypeStruct((B, PV), out_dtype),
        grid=grid,
        in_specs=[
            pl.BlockSpec((tb, F), lambda i: (i, 0)),       # activations: batch-tiled
            pl.BlockSpec((F, H), lambda i: (0, 0)),        # weights: VMEM-resident
            pl.BlockSpec((1, H), lambda i: (0, 0)),
            pl.BlockSpec((H, PV), lambda i: (0, 0)),
            pl.BlockSpec((1, PV), lambda i: (0, 0)),
        ],
        out_specs=pl.BlockSpec((tb, PV), lambda i: (i, 0)),  # lane-dense fused output
        compiler_params=pltpu.CompilerParams(
            dimension_semantics=("parallel",),
            vmem_limit_bytes=vmem_limit,
        ),
        cost_estimate=cost,
    )(features, prepared["w_sh"], prepared["b_sh"],
      prepared["w_head"], prepared["b_head"])
    return fused


def mlp_extractor_forward(features, prepared, **kwargs):
    """Module-equivalent forward: (latent_pi, latent_vf).

    For peak performance call `mlp_extractor_fused` and slice inside the
    consumer's jit (the column split then fuses into the consumer instead of
    materializing two extra HBM copies).
    """
    P = prepared["pi_dim"]
    fused = mlp_extractor_fused(features, prepared, **kwargs)
    return fused[:, :P], fused[:, P:]


def _torch_linear_init(key, out_dim, in_dim):
    """Deterministic init mimicking torch.nn.Linear default (uniform +/- 1/sqrt(in))."""
    kw, kb = jax.random.split(key)
    bound = 1.0 / jnp.sqrt(jnp.float32(in_dim))
    w = jax.random.uniform(kw, (out_dim, in_dim), jnp.float32, -bound, bound)
    b = jax.random.uniform(kb, (out_dim,), jnp.float32, -bound, bound)
    return w, b


if __name__ == "__main__":
    feature_dim = 32
    shared_dim = 64
    pi_dim = 64
    vf_dim = 64
    batch = 8

    root = jax.random.PRNGKey(0)
    k_x, k_sh, k_pi, k_vf = jax.random.split(root, 4)

    features = jax.random.normal(k_x, (batch, feature_dim), jnp.float32)

    w_sh, b_sh = _torch_linear_init(k_sh, shared_dim, feature_dim)
    w_pi, b_pi = _torch_linear_init(k_pi, pi_dim, shared_dim)
    w_vf, b_vf = _torch_linear_init(k_vf, vf_dim, shared_dim)
    params = dict(w_sh=w_sh, b_sh=b_sh, w_pi=w_pi, b_pi=b_pi, w_vf=w_vf, b_vf=b_vf)

    # Default path: bf16 MXU inputs (native on v5e/v6e/v7x), f32 bias/tanh/output.
    prepared_bf16 = prepare_params(params)
    # f32 path only for the exact (1e-5) reference match; bf16 breaks that
    # tolerance on every generation, not just v5e.
    prepared_f32 = prepare_params(params, compute_dtype=jnp.float32)

    fwd_bf16 = jax.jit(lambda f: mlp_extractor_forward(f, prepared_bf16))
    fwd_f32 = jax.jit(lambda f: mlp_extractor_forward(f, prepared_f32))

    latent_pi, latent_vf = fwd_bf16(features)
    pi_f32, vf_f32 = fwd_f32(features)
    jax.block_until_ready((latent_pi, latent_vf, pi_f32, vf_f32))

    # Pure-JAX reference check (PyTorch-convention math).
    h_ref = jnp.tanh(features @ w_sh.T + b_sh)
    pi_ref = jnp.tanh(h_ref @ w_pi.T + b_pi)
    vf_ref = jnp.tanh(h_ref @ w_vf.T + b_vf)

    assert jnp.allclose(pi_f32, pi_ref, atol=1e-5), "policy latent mismatch (f32)"
    assert jnp.allclose(vf_f32, vf_ref, atol=1e-5), "value latent mismatch (f32)"
    assert jnp.allclose(latent_pi, pi_ref, atol=3e-2), "policy latent mismatch (bf16)"
    assert jnp.allclose(latent_vf, vf_ref, atol=3e-2), "value latent mismatch (bf16)"

    print("KERNEL_OK")
</pallas_src>

<mosaic_0001>
module attributes {stable_mosaic.version = 11 : i64} {
  func.func @mlp_extractor_kernel(%arg0: i32, %arg1: memref<8x32xf32, #tpu.memory_space<vmem>>, %arg2: memref<32x64xbf16, #tpu.memory_space<vmem>>, %arg3: memref<1x64xf32, #tpu.memory_space<vmem>>, %arg4: memref<64x128xbf16, #tpu.memory_space<vmem>>, %arg5: memref<1x128xf32, #tpu.memory_space<vmem>>, %arg6: memref<8x128xf32, #tpu.memory_space<vmem>>) attributes {dimension_semantics = [#tpu.dimension_semantics<parallel>], iteration_bounds = array<i64: 1>, scalar_prefetch = 0 : i64, scratch_operands = 0 : i64, tpu.core_type = #tpu.core_type<tc>, window_params = [{transform_indices = @transform_0, window_bounds = array<i64: 8, 32>}, {pipeline_mode = #tpu.pipeline_mode<synchronous>, transform_indices = @transform_1, window_bounds = array<i64: 32, 64>}, {pipeline_mode = #tpu.pipeline_mode<synchronous>, transform_indices = @transform_2, window_bounds = array<i64: 1, 64>}, {pipeline_mode = #tpu.pipeline_mode<synchronous>, transform_indices = @transform_3, window_bounds = array<i64: 64, 128>}, {pipeline_mode = #tpu.pipeline_mode<synchronous>, transform_indices = @transform_4, window_bounds = array<i64: 1, 128>}, {transform_indices = @transform_5, window_bounds = array<i64: 8, 128>}]} {
    %c0 = arith.constant 0 : index
    %c0_0 = arith.constant 0 : index
    %0 = vector.load %arg1[%c0, %c0_0] : memref<8x32xf32, #tpu.memory_space<vmem>>, vector<8x32xf32>
    %1 = arith.truncf %0 : vector<8x32xf32> to vector<8x32xbf16>
    %c0_1 = arith.constant 0 : index
    %c0_2 = arith.constant 0 : index
    %2 = vector.load %arg2[%c0_1, %c0_2] : memref<32x64xbf16, #tpu.memory_space<vmem>>, vector<32x64xbf16>
    %cst = arith.constant dense<0.000000e+00> : vector<8x64xf32>
    %3 = tpu.matmul %1, %2, %cst {dimension_numbers = #tpu.dot_dimension_numbers<[1], [0], [0], [1], [0, 0, 1, 1], [], []>} : vector<8x32xbf16>, vector<32x64xbf16>, vector<8x64xf32> -> vector<8x64xf32>
    %c0_3 = arith.constant 0 : index
    %c0_4 = arith.constant 0 : index
    %4 = vector.load %arg3[%c0_3, %c0_4] : memref<1x64xf32, #tpu.memory_space<vmem>>, vector<1x64xf32>
    %5 = vector.broadcast %4 : vector<1x64xf32> to vector<8x64xf32>
    %6 = arith.addf %3, %5 : vector<8x64xf32>
    %7 = math.tanh %6 : vector<8x64xf32>
    %8 = arith.truncf %7 : vector<8x64xf32> to vector<8x64xbf16>
    %c0_5 = arith.constant 0 : index
    %c0_6 = arith.constant 0 : index
    %9 = vector.load %arg4[%c0_5, %c0_6] : memref<64x128xbf16, #tpu.memory_space<vmem>>, vector<64x128xbf16>
    %cst_7 = arith.constant dense<0.000000e+00> : vector<8x128xf32>
    %10 = tpu.matmul %8, %9, %cst_7 {dimension_numbers = #tpu.dot_dimension_numbers<[1], [0], [0], [1], [0, 0, 1, 1], [], []>} : vector<8x64xbf16>, vector<64x128xbf16>, vector<8x128xf32> -> vector<8x128xf32>
    %c0_8 = arith.constant 0 : index
    %c0_9 = arith.constant 0 : index
    %11 = vector.load %arg5[%c0_8, %c0_9] : memref<1x128xf32, #tpu.memory_space<vmem>>, vector<1x128xf32>
    %12 = vector.broadcast %11 : vector<1x128xf32> to vector<8x128xf32>
    %13 = arith.addf %10, %12 : vector<8x128xf32>
    %14 = math.tanh %13 : vector<8x128xf32>
    %c0_10 = arith.constant 0 : index
    %c0_11 = arith.constant 0 : index
    %15 = vector.load %arg6[%c0_10, %c0_11] : memref<8x128xf32, #tpu.memory_space<vmem>>, vector<8x128xf32>
    tpu.vector_store %arg6[%c0_10, %c0_11], %14 {strides = array<i32>} : memref<8x128xf32, #tpu.memory_space<vmem>>, vector<8x128xf32>,
    return
  }
  func.func @transform_0(%arg0: i32) -> (i32, i32) {
    %c0_i32 = arith.constant 0 : i32
    %c0_i32_0 = arith.constant 0 : i32
    return %arg0, %c0_i32 : i32, i32
  }
  func.func @transform_1(%arg0: i32) -> (i32, i32) {
    %c0_i32 = arith.constant 0 : i32
    %c0_i32_0 = arith.constant 0 : i32
    %c0_i32_1 = arith.constant 0 : i32
    return %c0_i32, %c0_i32_0 : i32, i32
  }
  func.func @transform_2(%arg0: i32) -> (i32, i32) {
    %c0_i32 = arith.constant 0 : i32
    %c0_i32_0 = arith.constant 0 : i32
    %c0_i32_1 = arith.constant 0 : i32
    return %c0_i32, %c0_i32_0 : i32, i32
  }
  func.func @transform_3(%arg0: i32) -> (i32, i32) {
    %c0_i32 = arith.constant 0 : i32
    %c0_i32_0 = arith.constant 0 : i32
    %c0_i32_1 = arith.constant 0 : i32
    return %c0_i32, %c0_i32_0 : i32, i32
  }
  func.func @transform_4(%arg0: i32) -> (i32, i32) {
    %c0_i32 = arith.constant 0 : i32
    %c0_i32_0 = arith.constant 0 : i32
    %c0_i32_1 = arith.constant 0 : i32
    return %c0_i32, %c0_i32_0 : i32, i32
  }
  func.func @transform_5(%arg0: i32) -> (i32, i32) {
    %c0_i32 = arith.constant 0 : i32
    %c0_i32_0 = arith.constant 0 : i32
    return %arg0, %c0_i32 : i32, i32
  }
}

</mosaic_0001>

<bundles_post_ra>
// kernel: _lambda_.1
= control target key start
LH: loop header
LB: loop body
LE: loop exit
PB: predicated region body
PF: predicated region fallthrough
CT: control target
= control target key end

     0   :  { %10 = vsyncpa [#allocation3], 0  ;;  %s393_s0 = inlined_call_operand.hbm [shape: f32[8,32], index: 0, kind: input, shape index: {}]   ;;  %s394_s1 = inlined_call_operand.vmem [shape: bf16[32,64], index: 1, kind: input, shape index: {}]   ;;  %s395_s2 = inlined_call_operand.vmem [shape: f32[1,64], index: 2, kind: input, shape index: {}]   ;;  %s396_s3 = inlined_call_operand.hbm [shape: bf16[64,128], index: 3, kind: input, shape index: {}]   ;;  %s397_s4 = inlined_call_operand.vmem [shape: f32[1,128], index: 4, kind: input, shape index: {}]   ;;  %s398_s5 = inlined_call_operand.vmem [shape: f32[8,128], index: 5, kind: output, shape index: {}]  }
   0x1   :  { %11 = vsyncpa [#allocation5], 0  ;;  %s311_s18 = smov [#allocation2]   ;;  %s312_s20 = smov [#allocation4]  }
   0x2   :  { %s18_s19 = sshll.u32 %s311_s18, 4  ;;  %s31_s21 = sshll.u32 %s312_s20, 4  ;;  %s19_s19 = int_to_ptr.vmem [resolvable:$true] %s18_s19  ;;  %s347_s21 = int_to_ptr.vmem [resolvable:$true] %s31_s21 }
   0x3   :  { %s263_s24 = scalar_lea.hbm %s393_s0, 128 }
   0x4   :  { %p264_p0 = scmp.ne.s32.totalorder %s393_s0, %s263_s24  ;;  %p267_p1 = scmp.lt.u32.totalorder %s263_s24, %s393_s0 }
   0x6   :  { %p269_p2 = pnand %p267_p1, %p264_p0 }
   0x8   :  { %272 = shalt.err (!%p269_p2)
}
   0x9   :  { %s273_s29 = scalar_lea.vmem %s19_s19, 128  ;;  %p278_p4 = scmp.lt.s32.totalorder %s19_s19, %s19_s19 }
   0xa   :  { %p274_p3 = scmp.ne.s32.totalorder %s19_s19, %s273_s29  ;;  %p279_p5 = scmp.lt.s32.totalorder %s273_s29, %s273_s29 }
   0xc   :  { %p280_p6 = por %p279_p5, %p278_p4 }
   0xe   :  { %p281_p7 = pnand %p280_p6, %p274_p3 }
  0x10   :  { %284 = shalt.err (!%p281_p7)
}
  0x11   :  { %21 = dma.hbm_to_vmem [thread:$0]  %s393_s0, 128, %s19_s19, [#allocation3]  }
  0x12   :  { %s285_s9 = scalar_lea.hbm %s396_s3, 512 }
  0x13   :  { %p286_p8 = scmp.ne.s32.totalorder %s396_s3, %s285_s9  ;;  %p289_p9 = scmp.lt.u32.totalorder %s285_s9, %s396_s3 }
  0x15   :  { %p291_p10 = pnand %p289_p9, %p286_p8 }
  0x17   :  { %294 = shalt.err (!%p291_p10)
}
  0x18   :  { %s295_s14 = scalar_lea.vmem %s347_s21, 512  ;;  %p300_p12 = scmp.lt.s32.totalorder %s347_s21, %s347_s21 }
  0x19   :  { %p296_p11 = scmp.ne.s32.totalorder %s347_s21, %s295_s14  ;;  %p301_p13 = scmp.lt.s32.totalorder %s295_s14, %s295_s14 }
  0x1b   :  { %p302_p0 = por %p301_p13, %p300_p12 }
  0x1d   :  { %p303_p1 = pnand %p302_p0, %p296_p11 }
  0x1f   :  { %306 = shalt.err (!%p303_p1)
}
  0x20   :  { %s313_s0 = smov 64   ;;  %s314_s15 = smov 4  }
  0x21   :  { %37 = dma.hbm_to_vmem [thread:$0]  %s396_s3, 512, %s347_s21, [#allocation5], %s313_s0, %s313_s0, %s314_s15  }
  0x22   :  { %307 = dma.done.wait [#allocation3], 128  }
  0x23   :  { %308 = vsyncadd [#allocation3], 4294967168 }
  0x24   :  { %309 = dma.done.wait [#allocation5], 512  }
  0x25   :  { %310 = vsyncadd [#allocation5], 4294966784  ;;  %v315_v0 = vmov 0.0   ;;  %vm316_vm0 = vmmov 0   ;;  %v253_v1 = vld [vmem:[%s394_s1] sm:$0xff]   ;;  %v254_v2 = vld [vmem:[%s394_s1 + $0x8] sm:$0xff]  }
  0x26   :  { %227 = vmatprep.subr.bf16.mxu0 %v315_v0  ;;  %231 = vmatprep.mubr.msk.bf16.mxu0 %vm316_vm0, %v315_v0  ;;  %v47_v3 = vld [vmem:[#allocation2] sm:$0xff]  ;;  %vm72_vm1 = vcmask 261120   ;;  %v255_v5 = vld [vmem:[#allocation4] sm:$0xff]   ;;  %v256_v6 = vld [vmem:[#allocation4 + $0x8] sm:$0xff]   ;;  %vm157_vm2 = vcmask 523264  }
  0x27   :  { %235 = vmatprep.subr.bf16.mxu1 %v315_v0  ;;  %243 = vmatprep.mubr.msk.bf16.mxu1 %vm316_vm0, %v315_v0  ;;  %v48_v4 = vpack.c.bf16 %v47_v3, %v47_v3  ;;  %v257_v7 = vld [vmem:[#allocation4 + $0x10] sm:$0xff]   ;;  %v258_v8 = vld [vmem:[#allocation4 + $0x18] sm:$0xff]  }
  0x28   :  { %228 = vmatpush3.bf16.msra.mxu0 %v253_v1  ;;  %236 = vmatpush3.bf16.msra.mxu1 %v255_v5  ;;  %v209_v9 = vld [vmem:[%s395_s2] ss:$0 sm:$0xff] }
  0x29   :  { %229 = vmatprep.subr.bf16.mxu0 %v315_v0  ;;  %237 = vmatprep.subr.bf16.mxu1 %v315_v0  ;;  %v213_v17 = vld [vmem:[%s397_s4] ss:$0 sm:$0xff] }
  0x2c   :  { %230 = vmatpush3.bf16.msra.mxu0 %v254_v2  ;;  %238 = vmatpush3.bf16.msra.mxu1 %v256_v6 }
  0x2d   :  { %239 = vmatprep.subr.bf16.mxu1 %v315_v0 }
  0x2f   :  { %232 = vmatmul.mubr.msk.bf16.vlgmr.msra.gmra.mrb[0].mxu0 %vm72_vm1, %v48_v4 }
  0x30   :  { %240 = vmatpush3.bf16.msra.mxu1 %v257_v7 }
  0x31   :  { %241 = vmatprep.subr.bf16.mxu1 %v315_v0 }
  0x34   :  { %242 = vmatpush3.bf16.msra.mxu1 %v258_v8 }
 0x102   :  { %v110_v10 = vpop.f32.mrb[0].mxu0 }
 0x103   :  { %v111_v11 = vadd.f32 %v209_v9, %v110_v10  ;;  %v233_v12 = vpop.f32.mrb[1].mxu0 }
 0x104   :  { %v113_v13 = vpop.f32.mrb[2].mxu0 }
 0x105   :  { %259 = vtanh.f32 %v111_v11  ;;  %v234_v14 = vpop.f32.mrb[3].mxu0 }
 0x10f   :  { %v260_v15 = vpop.eup %259 }
 0x110   :  { %v117_v16 = vpack.c.bf16 %v260_v15, %v260_v15 }
 0x112   :  { %244 = vmatmul.mubr.msk.bf16.vlgmr.msra.gmra.mrb[0].mxu1 %vm157_vm2, %v117_v16 }
 0x1e5   :  { %v195_v18 = vpop.f32.mrb[0].mxu1 }
 0x1e6   :  { %v196_v19 = vadd.f32 %v213_v17, %v195_v18  ;;  %v245_v20 = vpop.f32.mrb[1].mxu1 }
 0x1e7   :  { %v198_v21 = vpop.f32.mrb[2].mxu1 }
 0x1e8   :  { %261 = vtanh.f32 %v196_v19  ;;  %v246_v22 = vpop.f32.mrb[3].mxu1 }
 0x1f2   :  { %v262_v23 = vpop.eup %261 }
 0x1f3   :  { %202 = vst [vmem:[%s398_s5] sm:$0xff] %v262_v23 }
 0x1f4   :  { %207 = vsyncpa [#allocation3], 1 }
 0x1f5   :  { %208 = vsyncpa [#allocation5], 1 }

</bundles_post_ra>
